<compile_context>
chip_gen: v7x
topology: tpu7x:2x2x1
jax: 0.10.0
libtpu: 0.0.40
codegen_flags: <defaults>
</compile_context>

<pallas_src>
import functools

import jax
import jax.numpy as jnp
import numpy as np
from jax import lax
from jax.experimental import pallas as pl
from jax.experimental.pallas import tpu as pltpu


def _ce_sum_rows(logits_f32, pick_mask):
    """Sum over rows of (logsumexp(row) - logits[row, label]); returns (1, 1) f32."""
    m = jnp.max(logits_f32, axis=-1, keepdims=True)                               # [TB,1]
    lse = jnp.log(jnp.sum(jnp.exp(logits_f32 - m), axis=-1, keepdims=True)) + m   # [TB,1]
    picked = jnp.sum(jnp.where(pick_mask, logits_f32, 0.0),
                     axis=-1, keepdims=True)                                      # [TB,1]
    return jnp.sum(lse - picked, axis=(0, 1), keepdims=True)                      # (1,1)


def multimodal_loss_kernel(
    fused_ref, image_ref, text_ref, labels_ref, imgf_hbm, txtf_hbm,   # inputs
    out_ref,                                                          # (8,128) lane-packed row per outer slice
    acc_ref, imgf_vmem, txtf_vmem, feat_sem,                          # scratch
    *, temp, use_contrastive, col_block,
):
    o = pl.program_id(0)            # outer ("parallel") slice -> megacore shard on v7x
    i = pl.program_id(1)            # inner ("arbitrary") reduction step
    last = pl.num_programs(1) - 1
    lane = lax.broadcasted_iota(jnp.int32, (1, 128), 1)

    contrastive_on = bool(use_contrastive) and temp > 0

    @pl.when(i == 0)
    def _init():
        acc_ref[...] = jnp.zeros_like(acc_ref)

    if contrastive_on:
        # Fetch both feature arrays exactly once (single buffer, no auto
        # double-buffering); the DMA overlaps the whole CE sweep and is awaited
        # only in the finalize of outer slice 0.
        @pl.when(jnp.logical_and(o == 0, i == 0))
        def _start_feature_dma():
            pltpu.make_async_copy(imgf_hbm, imgf_vmem, feat_sem.at[0]).start()
            pltpu.make_async_copy(txtf_hbm, txtf_vmem, feat_sem.at[1]).start()

    # ---- per-block classification CE partial sums (f32 elementwise math) ----
    # TODO(synk): labels are assumed to be in [0, C); ignore_index semantics of
    # torch.nn.CrossEntropyLoss are not supported.
    labels_col = labels_ref[...]                                      # (TB, 1) int32
    cols = lax.broadcasted_iota(jnp.int32, fused_ref.shape, 1)        # hoisted: one iota/compare
    pick_mask = cols == labels_col                                    # reused by all three CEs
    f_part = _ce_sum_rows(fused_ref[...].astype(jnp.float32), pick_mask)
    i_part = _ce_sum_rows(image_ref[...].astype(jnp.float32), pick_mask)
    t_part = _ce_sum_rows(text_ref[...].astype(jnp.float32), pick_mask)
    # One lane-packed masked add per step (lanes 0/1/2 = fusion/image/text sums).
    acc_ref[...] += (jnp.where(lane == 0, f_part, 0.0)
                     + jnp.where(lane == 1, i_part, 0.0)
                     + jnp.where(lane == 2, t_part, 0.0))

    @pl.when(i == last)
    def _finalize():
        out_ref[...] = acc_ref[...]

    if contrastive_on:
        @pl.when(jnp.logical_and(o == 0, i == last))
        def _contrastive():
            # Features were prefetched at step (0, 0); wait only now.
            pltpu.make_async_copy(imgf_hbm, imgf_vmem, feat_sem.at[0]).wait()
            pltpu.make_async_copy(txtf_hbm, txtf_vmem, feat_sem.at[1]).wait()

            bsz = imgf_vmem.shape[0]
            n_cb = bsz // col_block
            inv_temp = 1.0 / temp
            imgf = imgf_vmem[...]                 # MXU operands stay in input dtype
            dn = (((1,), (1,)), ((), ()))         # contract on D, no materialized transpose
            rows = lax.broadcasted_iota(jnp.int32, (bsz, col_block), 0)
            cols_l = lax.broadcasted_iota(jnp.int32, (bsz, col_block), 1)

            # Online (flash-style) LSE over column blocks of sim = imgf @ txtf.T / temp:
            # no full [B, B] similarity matrix is materialized.
            def body(j, carry):
                row_m, row_s, col_lse_sum, diag_sum = carry
                start = pl.multiple_of(j * col_block, col_block)
                txt_blk = txtf_vmem[pl.ds(start, col_block), :]          # (CB, D)
                sim = lax.dot_general(imgf, txt_blk, dn,
                                      preferred_element_type=jnp.float32) * inv_temp
                # diagonal (shared by both CE directions)
                diag_sum = diag_sum + jnp.sum(
                    jnp.where(rows == cols_l + j * col_block, sim, 0.0),
                    axis=(0, 1), keepdims=True)
                # text->image: column-wise LSE is exact per column block
                cm = jnp.max(sim, axis=0, keepdims=True)
                col_lse = jnp.log(jnp.sum(jnp.exp(sim - cm), axis=0, keepdims=True)) + cm
                col_lse_sum = col_lse_sum + jnp.sum(col_lse, axis=(0, 1), keepdims=True)
                # image->text: online row-wise max/sum update
                bm = jnp.max(sim, axis=1, keepdims=True)
                new_m = jnp.maximum(row_m, bm)
                row_s = (row_s * jnp.exp(row_m - new_m)
                         + jnp.sum(jnp.exp(sim - new_m), axis=1, keepdims=True))
                return (new_m, row_s, col_lse_sum, diag_sum)

            init = (jnp.full((bsz, 1), -jnp.inf, jnp.float32),
                    jnp.zeros((bsz, 1), jnp.float32),
                    jnp.zeros((1, 1), jnp.float32),
                    jnp.zeros((1, 1), jnp.float32))
            row_m, row_s, col_lse_sum, diag_sum = lax.fori_loop(0, n_cb, body, init)
            row_lse_sum = jnp.sum(row_m + jnp.log(row_s), axis=(0, 1), keepdims=True)
            # Unscaled (i2t_sum + t2i_sum); the 0.5/B * weight scaling happens in the wrapper.
            contr_sum = row_lse_sum + col_lse_sum - 2.0 * diag_sum
            out_ref[...] += jnp.where(lane == 3, contr_sum, 0.0)


def _vmem_capacity_bytes():
    """Physical per-core VMEM (generation aware); conservative fallback."""
    try:
        info = pltpu.get_tpu_info()
        cap = getattr(info, "vmem_capacity_bytes", None)
        if cap:
            return int(cap)
    except Exception:
        pass
    return 64 << 20   # assume the smallest (v7x-sized) part if the query fails


def _choose_divisor(n, cap, mult):
    """Largest d <= cap with n % d == 0 and (d % mult == 0 or d == n)."""
    for cand in range(min(n, cap), 0, -1):
        if n % cand == 0 and (cand % mult == 0 or cand == n):
            return cand
    return n


def _choose_batch_tile(b, bytes_per_row, budget_bytes, sublane_mult, max_rows_cap=2048):
    """Largest sublane-aligned divisor of b whose double-buffered working set fits the budget."""
    max_rows = max(sublane_mult, budget_bytes // max(1, bytes_per_row))
    cap = min(b, max_rows_cap, max_rows)
    for cand in range(cap, 0, -1):
        if b % cand == 0 and (cand % sublane_mult == 0 or cand == b):
            return cand
    # TODO(synk): for odd/prime batch sizes pad the batch or mask a partial last block.
    return b


def multimodal_loss(outputs, labels, *, alpha=0.7, beta=0.15, gamma=0.15,
                    temp=0.07, use_contrastive=True, contrastive_weight=1.0,
                    batch_tile=None, contrastive_col_block=None):
    fused = outputs['fused_logits']
    image = outputs['image_logits']
    text = outputs['text_logits']
    imgf = outputs['image_features']   # keep input dtype (bf16 ok); MXU accumulates f32
    txtf = outputs['text_features']

    b, c = fused.shape
    d = imgf.shape[1]
    labels2d = labels.astype(jnp.int32).reshape(b, 1)   # glue: tiny (B, 1) int32

    logit_isz = jnp.dtype(fused.dtype).itemsize
    feat_isz = jnp.dtype(imgf.dtype).itemsize
    contrastive_on = bool(use_contrastive) and temp > 0

    # ---- generation-aware VMEM budget --------------------------------------
    usable_vmem = int(_vmem_capacity_bytes() * 0.85)     # ~56 MiB v7x, ~109 MiB v5e/v6e
    headroom = 2 << 20

    if contrastive_on:
        if contrastive_col_block and b % contrastive_col_block == 0:
            col_block = contrastive_col_block
        else:
            col_block = _choose_divisor(b, 512, 8)
        feat_resident = 2 * b * d * feat_isz              # single-buffered (manual DMA)
        contr_tmp = 4 * b * col_block * 4 + 8 * b * 4     # sim column block + exp temps + row stats
    else:
        col_block = 1
        feat_resident = 0
        contr_tmp = 0

    # Per-row cost of the CE sweep: 3 double-buffered logit arrays + lane-padded label tile.
    bytes_per_row = 3 * 2 * c * logit_isz + 2 * 128 * 4
    logit_budget = max(usable_vmem - feat_resident - contr_tmp - headroom, 4 << 20)
    sublane_mult = 8 * max(1, 4 // max(1, logit_isz))     # 8 f32 / 16 bf16 / 32 int8
    if batch_tile and b % batch_tile == 0:
        tb = batch_tile
    else:
        tb = _choose_batch_tile(b, bytes_per_row, logit_budget, sublane_mult)

    n_blocks = b // tb
    n_outer = 2 if (n_blocks >= 2 and n_blocks % 2 == 0) else 1   # v7x megacore split
    n_inner = n_blocks // n_outer

    vmem_est = bytes_per_row * tb + feat_resident + contr_tmp + headroom
    vmem_limit = int(min(usable_vmem, max(vmem_est, 16 << 20)))

    # Dummy (tiny) feature scratch when the contrastive path is statically off.
    feat_shape_img = tuple(imgf.shape) if contrastive_on else (8, 128)
    feat_shape_txt = tuple(txtf.shape) if contrastive_on else (8, 128)

    kernel = functools.partial(
        multimodal_loss_kernel,
        temp=temp, use_contrastive=use_contrastive, col_block=col_block)

    packed = pl.pallas_call(
        kernel,
        out_shape=jax.ShapeDtypeStruct((n_outer * 8, 128), jnp.float32),
        grid=(n_outer, n_inner),
        in_specs=[
            pl.BlockSpec((tb, c), lambda o, i: (o * n_inner + i, 0)),   # fused_logits
            pl.BlockSpec((tb, c), lambda o, i: (o * n_inner + i, 0)),   # image_logits
            pl.BlockSpec((tb, c), lambda o, i: (o * n_inner + i, 0)),   # text_logits
            pl.BlockSpec((tb, 1), lambda o, i: (o * n_inner + i, 0)),   # labels
            pl.BlockSpec(memory_space=pl.ANY),                          # image_features (manual DMA)
            pl.BlockSpec(memory_space=pl.ANY),                          # text_features  (manual DMA)
        ],
        out_specs=pl.BlockSpec((8, 128), lambda o, i: (o, 0)),
        scratch_shapes=[
            pltpu.VMEM((8, 128), jnp.float32),            # lane-packed CE partial sums
            pltpu.VMEM(feat_shape_img, imgf.dtype),       # image features (single buffer)
            pltpu.VMEM(feat_shape_txt, txtf.dtype),       # text features  (single buffer)
            pltpu.SemaphoreType.DMA((2,)),
        ],
        compiler_params=pltpu.CompilerParams(
            dimension_semantics=("parallel", "arbitrary"),
            vmem_limit_bytes=vmem_limit),
    )(fused, image, text, labels2d, imgf, txtf)

    # Tiny cross-core combine + final weighting (scalar work; done in the wrapper
    # so the "parallel" outer axis can be megacore-sharded on v7x).
    rows = packed.reshape(n_outer, 8, 128)[:, 0, :]       # (n_outer, 128)
    inv_b = 1.0 / b
    fusion_loss = jnp.sum(rows[:, 0]) * inv_b
    image_loss = jnp.sum(rows[:, 1]) * inv_b
    text_loss = jnp.sum(rows[:, 2]) * inv_b
    if contrastive_on:
        contrastive_loss = rows[0, 3] * (0.5 * inv_b) * contrastive_weight
    else:
        contrastive_loss = jnp.float32(0.0)
    total = alpha * fusion_loss + beta * image_loss + gamma * text_loss
    if use_contrastive:
        total = total + contrastive_loss
    return {'total': total, 'fusion': fusion_loss, 'image': image_loss,
            'text': text_loss, 'contrastive': contrastive_loss}


def _reference_loss(outputs, labels, *, alpha=0.7, beta=0.15, gamma=0.15,
                    temp=0.07, use_contrastive=True, contrastive_weight=1.0):
    """Pure-JAX reference mirroring the PyTorch module."""
    def ce(logits, tgt):
        logits = logits.astype(jnp.float32)
        logp = jax.nn.log_softmax(logits, axis=-1)
        return -jnp.mean(jnp.take_along_axis(logp, tgt[:, None], axis=-1))

    fusion = ce(outputs['fused_logits'], labels)
    image = ce(outputs['image_logits'], labels)
    text = ce(outputs['text_logits'], labels)
    imgf = outputs['image_features'].astype(jnp.float32)
    txtf = outputs['text_features'].astype(jnp.float32)
    contrastive = jnp.float32(0.0)
    if use_contrastive and temp > 0:
        logits = imgf @ txtf.T / temp
        tgt = jnp.arange(imgf.shape[0])
        contrastive = (ce(logits, tgt) + ce(logits.T, tgt)) / 2.0 * contrastive_weight
    total = alpha * fusion + beta * image + gamma * text
    if use_contrastive:
        total = total + contrastive
    return {'total': total, 'fusion': fusion, 'image': image,
            'text': text, 'contrastive': contrastive}


if __name__ == "__main__":
    def _l2norm(x):
        return x / jnp.linalg.norm(x, axis=-1, keepdims=True)

    def _make_inputs(key, b, c, d):
        k1, k2, k3, k4, k5, k6 = jax.random.split(key, 6)
        outs = {
            'fused_logits': jax.random.normal(k1, (b, c), jnp.float32),
            'image_logits': jax.random.normal(k2, (b, c), jnp.float32),
            'text_logits': jax.random.normal(k3, (b, c), jnp.float32),
            'image_features': _l2norm(jax.random.normal(k4, (b, d), jnp.float32)),
            'text_features': _l2norm(jax.random.normal(k5, (b, d), jnp.float32)),
        }
        lbl = jax.random.randint(k6, (b,), 0, c, dtype=jnp.int32)
        return outs, lbl

    key = jax.random.PRNGKey(0)
    cases = [
        # (B, C, D, kernel kwargs) — small but lane-dense shapes.
        (8, 128, 128, {}),                                              # single CE block / single column block
        (32, 256, 128, dict(batch_tile=8, contrastive_col_block=8)),    # multi-block CE, 2 outer slices, online contrastive
        (16, 128, 128, dict(use_contrastive=False)),                    # contrastive path statically disabled
    ]
    for (b, c, d, kw) in cases:
        key, sub = jax.random.split(key)
        outs, lbl = _make_inputs(sub, b, c, d)
        got = jax.block_until_ready(multimodal_loss(outs, lbl, **kw))
        ref_kw = {k: v for k, v in kw.items()
                  if k in ('alpha', 'beta', 'gamma', 'temp', 'use_contrastive', 'contrastive_weight')}
        want = _reference_loss(outs, lbl, **ref_kw)
        for name in ('total', 'fusion', 'image', 'text', 'contrastive'):
            np.testing.assert_allclose(np.asarray(got[name]),
                                       np.asarray(want[name]), rtol=1e-5, atol=1e-5)

    print("KERNEL_OK")
</pallas_src>

<mosaic_0001>
module attributes {stable_mosaic.version = 11 : i64} {
  func.func @multimodal_loss_kernel(%arg0: i32, %arg1: i32, %arg2: memref<8x128xf32, #tpu.memory_space<vmem>>, %arg3: memref<8x128xf32, #tpu.memory_space<vmem>>, %arg4: memref<8x128xf32, #tpu.memory_space<vmem>>, %arg5: memref<8x1xi32, #tpu.memory_space<vmem>>, %arg6: memref<8x128xf32, #tpu.memory_space<any>>, %arg7: memref<8x128xf32, #tpu.memory_space<any>>, %arg8: memref<8x128xf32, #tpu.memory_space<vmem>>, %arg9: memref<8x128xf32, #tpu.memory_space<vmem>>, %arg10: memref<8x128xf32, #tpu.memory_space<vmem>>, %arg11: memref<8x128xf32, #tpu.memory_space<vmem>>, %arg12: memref<2x!tpu.dma_semaphore, #tpu.memory_space<semaphore_mem>>) attributes {dimension_semantics = [#tpu.dimension_semantics<parallel>, #tpu.dimension_semantics<arbitrary>], iteration_bounds = array<i64: 1, 1>, scalar_prefetch = 0 : i64, scratch_operands = 4 : i64, tpu.core_type = #tpu.core_type<tc>, window_params = [{transform_indices = @transform_0, window_bounds = array<i64: 8, 128>}, {transform_indices = @transform_1, window_bounds = array<i64: 8, 128>}, {transform_indices = @transform_2, window_bounds = array<i64: 8, 128>}, {transform_indices = @transform_3, window_bounds = array<i64: 8, 1>}, {}, {}, {transform_indices = @transform_6, window_bounds = array<i64: 8, 128>}]} {
    %0 = tpu.iota {dimensions = array<i32: 1>} : vector<1x128xi32>
    %c0_i32 = arith.constant 0 : i32
    %1 = arith.cmpi eq, %arg1, %c0_i32 : i32
    %2 = arith.extui %1 : i1 to i32
    %c0_i32_0 = arith.constant 0 : i32
    %3 = arith.cmpi ne, %2, %c0_i32_0 : i32
    scf.if %3 {
      %cst_38 = arith.constant 0.000000e+00 : f32
      %105 = vector.broadcast %cst_38 : f32 to vector<8x128xf32>
      %c0_39 = arith.constant 0 : index
      %c0_40 = arith.constant 0 : index
      %106 = vector.load %arg9[%c0_39, %c0_40] : memref<8x128xf32, #tpu.memory_space<vmem>>, vector<8x128xf32>
      tpu.vector_store %arg9[%c0_39, %c0_40], %105 {strides = array<i32>} : memref<8x128xf32, #tpu.memory_space<vmem>>, vector<8x128xf32>,
    } else {
    }
    %c0_i32_1 = arith.constant 0 : i32
    %4 = arith.cmpi eq, %arg0, %c0_i32_1 : i32
    %c0_i32_2 = arith.constant 0 : i32
    %5 = arith.cmpi eq, %arg1, %c0_i32_2 : i32
    %6 = arith.andi %4, %5 : i1
    %7 = arith.extui %6 : i1 to i32
    %c0_i32_3 = arith.constant 0 : i32
    %8 = arith.cmpi ne, %7, %c0_i32_3 : i32
    scf.if %8 {
      %c0_i32_38 = arith.constant 0 : i32
      %105 = tpu.memref_slice %arg12[%c0_i32_38] : memref<2x!tpu.dma_semaphore, #tpu.memory_space<semaphore_mem>> -> memref<1x!tpu.dma_semaphore, #tpu.memory_space<semaphore_mem>>
      %106 = tpu.memref_squeeze %105 : memref<1x!tpu.dma_semaphore, #tpu.memory_space<semaphore_mem>> -> memref<!tpu.dma_semaphore, #tpu.memory_space<semaphore_mem>>
      tpu.enqueue_dma source(%arg6 : memref<8x128xf32, #tpu.memory_space<any>>) target(%arg10 : memref<8x128xf32, #tpu.memory_space<vmem>>) target_semaphore(%106 : memref<!tpu.dma_semaphore, #tpu.memory_space<semaphore_mem>>)
      %c1_i32_39 = arith.constant 1 : i32
      %107 = tpu.memref_slice %arg12[%c1_i32_39] : memref<2x!tpu.dma_semaphore, #tpu.memory_space<semaphore_mem>> -> memref<1x!tpu.dma_semaphore, #tpu.memory_space<semaphore_mem>>
      %108 = tpu.memref_squeeze %107 : memref<1x!tpu.dma_semaphore, #tpu.memory_space<semaphore_mem>> -> memref<!tpu.dma_semaphore, #tpu.memory_space<semaphore_mem>>
      tpu.enqueue_dma source(%arg7 : memref<8x128xf32, #tpu.memory_space<any>>) target(%arg11 : memref<8x128xf32, #tpu.memory_space<vmem>>) target_semaphore(%108 : memref<!tpu.dma_semaphore, #tpu.memory_space<semaphore_mem>>)
    } else {
    }
    %c0 = arith.constant 0 : index
    %c0_4 = arith.constant 0 : index
    %9 = vector.load %arg5[%c0, %c0_4] : memref<8x1xi32, #tpu.memory_space<vmem>>, vector<8x1xi32>
    %10 = tpu.iota {dimensions = array<i32: 1>} : vector<8x128xi32>
    %11 = vector.broadcast %9 : vector<8x1xi32> to vector<8x128xi32>
    %12 = arith.cmpi eq, %10, %11 : vector<8x128xi32>
    %c0_5 = arith.constant 0 : index
    %c0_6 = arith.constant 0 : index
    %13 = vector.load %arg2[%c0_5, %c0_6] : memref<8x128xf32, #tpu.memory_space<vmem>>, vector<8x128xf32>
    %cst = arith.constant dense<0xFF800000> : vector<8xf32>
    %14 = vector.multi_reduction <maximumf>, %13, %cst [1] : vector<8x128xf32> to vector<8xf32>
    %15 = vector.shape_cast %14 : vector<8xf32> to vector<8x1xf32>
    %16 = vector.broadcast %15 : vector<8x1xf32> to vector<8x128xf32>
    %17 = arith.subf %13, %16 : vector<8x128xf32>
    %18 = math.exp %17 : vector<8x128xf32>
    %cst_7 = arith.constant dense<0.000000e+00> : vector<8xf32>
    %19 = vector.multi_reduction <add>, %18, %cst_7 [1] : vector<8x128xf32> to vector<8xf32>
    %20 = vector.shape_cast %19 : vector<8xf32> to vector<8x1xf32>
    %21 = math.log %20 : vector<8x1xf32>
    %22 = arith.addf %21, %15 : vector<8x1xf32>
    %cst_8 = arith.constant 0.000000e+00 : f32
    %23 = vector.broadcast %cst_8 : f32 to vector<8x128xf32>
    %24 = arith.select %12, %13, %23 : vector<8x128xi1>, vector<8x128xf32>
    %cst_9 = arith.constant dense<0.000000e+00> : vector<8xf32>
    %25 = vector.multi_reduction <add>, %24, %cst_9 [1] : vector<8x128xf32> to vector<8xf32>
    %26 = vector.shape_cast %25 : vector<8xf32> to vector<8x1xf32>
    %27 = arith.subf %22, %26 : vector<8x1xf32>
    %28 = vector.shape_cast %27 : vector<8x1xf32> to vector<1x8x1xf32>
    %cst_10 = arith.constant dense<0.000000e+00> : vector<1xf32>
    %29 = vector.multi_reduction <add>, %28, %cst_10 [1, 2] : vector<1x8x1xf32> to vector<1xf32>
    %30 = vector.shape_cast %29 : vector<1xf32> to vector<1x1x1xf32>
    %31 = vector.extract %30[0, 0, 0] : f32 from vector<1x1x1xf32>
    %32 = vector.broadcast %31 : f32 to vector<1x1xf32>
    %c0_11 = arith.constant 0 : index
    %c0_12 = arith.constant 0 : index
    %33 = vector.load %arg3[%c0_11, %c0_12] : memref<8x128xf32, #tpu.memory_space<vmem>>, vector<8x128xf32>
    %cst_13 = arith.constant dense<0xFF800000> : vector<8xf32>
    %34 = vector.multi_reduction <maximumf>, %33, %cst_13 [1] : vector<8x128xf32> to vector<8xf32>
    %35 = vector.shape_cast %34 : vector<8xf32> to vector<8x1xf32>
    %36 = vector.broadcast %35 : vector<8x1xf32> to vector<8x128xf32>
    %37 = arith.subf %33, %36 : vector<8x128xf32>
    %38 = math.exp %37 : vector<8x128xf32>
    %cst_14 = arith.constant dense<0.000000e+00> : vector<8xf32>
    %39 = vector.multi_reduction <add>, %38, %cst_14 [1] : vector<8x128xf32> to vector<8xf32>
    %40 = vector.shape_cast %39 : vector<8xf32> to vector<8x1xf32>
    %41 = math.log %40 : vector<8x1xf32>
    %42 = arith.addf %41, %35 : vector<8x1xf32>
    %cst_15 = arith.constant 0.000000e+00 : f32
    %43 = vector.broadcast %cst_15 : f32 to vector<8x128xf32>
    %44 = arith.select %12, %33, %43 : vector<8x128xi1>, vector<8x128xf32>
    %cst_16 = arith.constant dense<0.000000e+00> : vector<8xf32>
    %45 = vector.multi_reduction <add>, %44, %cst_16 [1] : vector<8x128xf32> to vector<8xf32>
    %46 = vector.shape_cast %45 : vector<8xf32> to vector<8x1xf32>
    %47 = arith.subf %42, %46 : vector<8x1xf32>
    %48 = vector.shape_cast %47 : vector<8x1xf32> to vector<1x8x1xf32>
    %cst_17 = arith.constant dense<0.000000e+00> : vector<1xf32>
    %49 = vector.multi_reduction <add>, %48, %cst_17 [1, 2] : vector<1x8x1xf32> to vector<1xf32>
    %50 = vector.shape_cast %49 : vector<1xf32> to vector<1x1x1xf32>
    %51 = vector.extract %50[0, 0, 0] : f32 from vector<1x1x1xf32>
    %52 = vector.broadcast %51 : f32 to vector<1x1xf32>
    %c0_18 = arith.constant 0 : index
    %c0_19 = arith.constant 0 : index
    %53 = vector.load %arg4[%c0_18, %c0_19] : memref<8x128xf32, #tpu.memory_space<vmem>>, vector<8x128xf32>
    %cst_20 = arith.constant dense<0xFF800000> : vector<8xf32>
    %54 = vector.multi_reduction <maximumf>, %53, %cst_20 [1] : vector<8x128xf32> to vector<8xf32>
    %55 = vector.shape_cast %54 : vector<8xf32> to vector<8x1xf32>
    %56 = vector.broadcast %55 : vector<8x1xf32> to vector<8x128xf32>
    %57 = arith.subf %53, %56 : vector<8x128xf32>
    %58 = math.exp %57 : vector<8x128xf32>
    %cst_21 = arith.constant dense<0.000000e+00> : vector<8xf32>
    %59 = vector.multi_reduction <add>, %58, %cst_21 [1] : vector<8x128xf32> to vector<8xf32>
    %60 = vector.shape_cast %59 : vector<8xf32> to vector<8x1xf32>
    %61 = math.log %60 : vector<8x1xf32>
    %62 = arith.addf %61, %55 : vector<8x1xf32>
    %cst_22 = arith.constant 0.000000e+00 : f32
    %63 = vector.broadcast %cst_22 : f32 to vector<8x128xf32>
    %64 = arith.select %12, %53, %63 : vector<8x128xi1>, vector<8x128xf32>
    %cst_23 = arith.constant dense<0.000000e+00> : vector<8xf32>
    %65 = vector.multi_reduction <add>, %64, %cst_23 [1] : vector<8x128xf32> to vector<8xf32>
    %66 = vector.shape_cast %65 : vector<8xf32> to vector<8x1xf32>
    %67 = arith.subf %62, %66 : vector<8x1xf32>
    %68 = vector.shape_cast %67 : vector<8x1xf32> to vector<1x8x1xf32>
    %cst_24 = arith.constant dense<0.000000e+00> : vector<1xf32>
    %69 = vector.multi_reduction <add>, %68, %cst_24 [1, 2] : vector<1x8x1xf32> to vector<1xf32>
    %70 = vector.shape_cast %69 : vector<1xf32> to vector<1x1x1xf32>
    %71 = vector.extract %70[0, 0, 0] : f32 from vector<1x1x1xf32>
    %72 = vector.broadcast %71 : f32 to vector<1x1xf32>
    %c0_25 = arith.constant 0 : index
    %c0_26 = arith.constant 0 : index
    %73 = vector.load %arg9[%c0_25, %c0_26] : memref<8x128xf32, #tpu.memory_space<vmem>>, vector<8x128xf32>
    %c0_i32_27 = arith.constant 0 : i32
    %74 = vector.broadcast %c0_i32_27 : i32 to vector<1x128xi32>
    %75 = arith.cmpi eq, %0, %74 : vector<1x128xi32>
    %cst_28 = arith.constant 0.000000e+00 : f32
    %76 = vector.shape_cast %32 : vector<1x1xf32> to vector<1x1xf32>
    %77 = vector.broadcast %76 : vector<1x1xf32> to vector<1x128xf32>
    %78 = vector.broadcast %cst_28 : f32 to vector<1x128xf32>
    %79 = arith.select %75, %77, %78 : vector<1x128xi1>, vector<1x128xf32>
    %c1_i32 = arith.constant 1 : i32
    %80 = vector.broadcast %c1_i32 : i32 to vector<1x128xi32>
    %81 = arith.cmpi eq, %0, %80 : vector<1x128xi32>
    %cst_29 = arith.constant 0.000000e+00 : f32
    %82 = vector.shape_cast %52 : vector<1x1xf32> to vector<1x1xf32>
    %83 = vector.broadcast %82 : vector<1x1xf32> to vector<1x128xf32>
    %84 = vector.broadcast %cst_29 : f32 to vector<1x128xf32>
    %85 = arith.select %81, %83, %84 : vector<1x128xi1>, vector<1x128xf32>
    %86 = arith.addf %79, %85 : vector<1x128xf32>
    %c2_i32 = arith.constant 2 : i32
    %87 = vector.broadcast %c2_i32 : i32 to vector<1x128xi32>
    %88 = arith.cmpi eq, %0, %87 : vector<1x128xi32>
    %cst_30 = arith.constant 0.000000e+00 : f32
    %89 = vector.shape_cast %72 : vector<1x1xf32> to vector<1x1xf32>
    %90 = vector.broadcast %89 : vector<1x1xf32> to vector<1x128xf32>
    %91 = vector.broadcast %cst_30 : f32 to vector<1x128xf32>
    %92 = arith.select %88, %90, %91 : vector<1x128xi1>, vector<1x128xf32>
    %93 = arith.addf %86, %92 : vector<1x128xf32>
    %94 = vector.broadcast %93 : vector<1x128xf32> to vector<8x128xf32>
    %95 = arith.addf %73, %94 : vector<8x128xf32>
    %c0_31 = arith.constant 0 : index
    %c0_32 = arith.constant 0 : index
    %96 = vector.load %arg9[%c0_31, %c0_32] : memref<8x128xf32, #tpu.memory_space<vmem>>, vector<8x128xf32>
    tpu.vector_store %arg9[%c0_31, %c0_32], %95 {strides = array<i32>} : memref<8x128xf32, #tpu.memory_space<vmem>>, vector<8x128xf32>,
    %c0_i32_33 = arith.constant 0 : i32
    %97 = arith.cmpi eq, %arg1, %c0_i32_33 : i32
    %98 = arith.extui %97 : i1 to i32
    %c0_i32_34 = arith.constant 0 : i32
    %99 = arith.cmpi ne, %98, %c0_i32_34 : i32
    scf.if %99 {
      %c0_38 = arith.constant 0 : index
      %c0_39 = arith.constant 0 : index
      %105 = vector.load %arg9[%c0_38, %c0_39] : memref<8x128xf32, #tpu.memory_space<vmem>>, vector<8x128xf32>
      %c0_40 = arith.constant 0 : index
      %c0_41 = arith.constant 0 : index
      %106 = vector.load %arg8[%c0_40, %c0_41] : memref<8x128xf32, #tpu.memory_space<vmem>>, vector<8x128xf32>
      tpu.vector_store %arg8[%c0_40, %c0_41], %105 {strides = array<i32>} : memref<8x128xf32, #tpu.memory_space<vmem>>, vector<8x128xf32>,
    } else {
    }
    %c0_i32_35 = arith.constant 0 : i32
    %100 = arith.cmpi eq, %arg0, %c0_i32_35 : i32
    %c0_i32_36 = arith.constant 0 : i32
    %101 = arith.cmpi eq, %arg1, %c0_i32_36 : i32
    %102 = arith.andi %100, %101 : i1
    %103 = arith.extui %102 : i1 to i32
    %c0_i32_37 = arith.constant 0 : i32
    %104 = arith.cmpi ne, %103, %c0_i32_37 : i32
    scf.if %104 {
      %c0_i32_38 = arith.constant 0 : i32
      %105 = tpu.memref_slice %arg12[%c0_i32_38] : memref<2x!tpu.dma_semaphore, #tpu.memory_space<semaphore_mem>> -> memref<1x!tpu.dma_semaphore, #tpu.memory_space<semaphore_mem>>
      %106 = tpu.memref_squeeze %105 : memref<1x!tpu.dma_semaphore, #tpu.memory_space<semaphore_mem>> -> memref<!tpu.dma_semaphore, #tpu.memory_space<semaphore_mem>>
      tpu.wait_dma2 semaphore(%106 : memref<!tpu.dma_semaphore, #tpu.memory_space<semaphore_mem>>) src(%arg6 : memref<8x128xf32, #tpu.memory_space<any>>) dst(%arg10 : memref<8x128xf32, #tpu.memory_space<vmem>>)
      %c1_i32_39 = arith.constant 1 : i32
      %107 = tpu.memref_slice %arg12[%c1_i32_39] : memref<2x!tpu.dma_semaphore, #tpu.memory_space<semaphore_mem>> -> memref<1x!tpu.dma_semaphore, #tpu.memory_space<semaphore_mem>>
      %108 = tpu.memref_squeeze %107 : memref<1x!tpu.dma_semaphore, #tpu.memory_space<semaphore_mem>> -> memref<!tpu.dma_semaphore, #tpu.memory_space<semaphore_mem>>
      tpu.wait_dma2 semaphore(%108 : memref<!tpu.dma_semaphore, #tpu.memory_space<semaphore_mem>>) src(%arg7 : memref<8x128xf32, #tpu.memory_space<any>>) dst(%arg11 : memref<8x128xf32, #tpu.memory_space<vmem>>)
      %c0_40 = arith.constant 0 : index
      %c0_41 = arith.constant 0 : index
      %109 = vector.load %arg10[%c0_40, %c0_41] : memref<8x128xf32, #tpu.memory_space<vmem>>, vector<8x128xf32>
      %110 = tpu.iota {dimensions = array<i32: 0>} : vector<8x8xi32>
      %111 = tpu.iota {dimensions = array<i32: 1>} : vector<8x8xi32>
      %cst_42 = arith.constant 0xFF800000 : f32
      %112 = vector.broadcast %cst_42 : f32 to vector<8x1xf32>
      %cst_43 = arith.constant 0.000000e+00 : f32
      %113 = vector.broadcast %cst_43 : f32 to vector<8x1xf32>
      %cst_44 = arith.constant 0.000000e+00 : f32
      %114 = vector.broadcast %cst_44 : f32 to vector<1x1xf32>
      %cst_45 = arith.constant 0.000000e+00 : f32
      %115 = vector.broadcast %cst_45 : f32 to vector<1x1xf32>
      %c0_i32_46 = arith.constant 0 : i32
      %c8_i32 = arith.constant 8 : i32
      %116 = arith.muli %c0_i32_46, %c8_i32 : i32
      %117 = tpu.assume_multiple %116, 8 : i32
      %118 = arith.index_cast %117 : i32 to index
      %c0_47 = arith.constant 0 : index
      %119 = vector.load %arg11[%118, %c0_47] : memref<8x128xf32, #tpu.memory_space<vmem>>, vector<8x128xf32>
      %cst_48 = arith.constant dense<0.000000e+00> : vector<8x8xf32>
      %120 = tpu.matmul %109, %119, %cst_48 {dimension_numbers = #tpu.dot_dimension_numbers<[1], [1], [0], [0], [0, 0, 1, 0], [], []>} : vector<8x128xf32>, vector<8x128xf32>, vector<8x8xf32> -> vector<8x8xf32>
      %cst_49 = arith.constant 14.2857141 : f32
      %121 = vector.broadcast %cst_49 : f32 to vector<8x8xf32>
      %122 = arith.mulf %120, %121 : vector<8x8xf32>
      %c8_i32_50 = arith.constant 8 : i32
      %123 = arith.muli %c0_i32_46, %c8_i32_50 : i32
      %124 = vector.broadcast %123 : i32 to vector<8x8xi32>
      %125 = arith.addi %111, %124 : vector<8x8xi32>
      %126 = arith.cmpi eq, %110, %125 : vector<8x8xi32>
      %cst_51 = arith.constant 0.000000e+00 : f32
      %127 = vector.broadcast %cst_51 : f32 to vector<8x8xf32>
      %128 = arith.select %126, %122, %127 : vector<8x8xi1>, vector<8x8xf32>
      %129 = vector.shape_cast %128 : vector<8x8xf32> to vector<1x8x8xf32>
      %cst_52 = arith.constant dense<0.000000e+00> : vector<1xf32>
      %130 = vector.multi_reduction <add>, %129, %cst_52 [1, 2] : vector<1x8x8xf32> to vector<1xf32>
      %131 = vector.shape_cast %130 : vector<1xf32> to vector<1x1x1xf32>
      %132 = vector.extract %131[0, 0, 0] : f32 from vector<1x1x1xf32>
      %133 = vector.broadcast %132 : f32 to vector<1x1xf32>
      %134 = arith.addf %115, %133 : vector<1x1xf32>
      %cst_53 = arith.constant dense<0xFF800000> : vector<8xf32>
      %135 = vector.multi_reduction <maximumf>, %122, %cst_53 [0] : vector<8x8xf32> to vector<8xf32>
      %136 = vector.shape_cast %135 : vector<8xf32> to vector<1x8xf32>
      %137 = vector.broadcast %136 : vector<1x8xf32> to vector<8x8xf32>
      %138 = arith.subf %122, %137 : vector<8x8xf32>
      %139 = math.exp %138 : vector<8x8xf32>
      %cst_54 = arith.constant dense<0.000000e+00> : vector<8xf32>
      %140 = vector.multi_reduction <add>, %139, %cst_54 [0] : vector<8x8xf32> to vector<8xf32>
      %141 = vector.shape_cast %140 : vector<8xf32> to vector<1x8xf32>
      %142 = math.log %141 : vector<1x8xf32>
      %143 = arith.addf %142, %136 : vector<1x8xf32>
      %144 = vector.shape_cast %143 : vector<1x8xf32> to vector<1x1x8xf32>
      %cst_55 = arith.constant dense<0.000000e+00> : vector<1xf32>
      %145 = vector.multi_reduction <add>, %144, %cst_55 [1, 2] : vector<1x1x8xf32> to vector<1xf32>
      %146 = vector.shape_cast %145 : vector<1xf32> to vector<1x1x1xf32>
      %147 = vector.extract %146[0, 0, 0] : f32 from vector<1x1x1xf32>
      %148 = vector.broadcast %147 : f32 to vector<1x1xf32>
      %149 = arith.addf %114, %148 : vector<1x1xf32>
      %cst_56 = arith.constant dense<0xFF800000> : vector<8xf32>
      %150 = vector.multi_reduction <maximumf>, %122, %cst_56 [1] : vector<8x8xf32> to vector<8xf32>
      %151 = vector.shape_cast %150 : vector<8xf32> to vector<8x1xf32>
      %152 = arith.maximumf %112, %151 : vector<8x1xf32>
      %153 = arith.subf %112, %152 : vector<8x1xf32>
      %154 = math.exp %153 : vector<8x1xf32>
      %155 = arith.mulf %113, %154 : vector<8x1xf32>
      %156 = vector.broadcast %152 : vector<8x1xf32> to vector<8x8xf32>
      %157 = arith.subf %122, %156 : vector<8x8xf32>
      %158 = math.exp %157 : vector<8x8xf32>
      %cst_57 = arith.constant dense<0.000000e+00> : vector<8xf32>
      %159 = vector.multi_reduction <add>, %158, %cst_57 [1] : vector<8x8xf32> to vector<8xf32>
      %160 = vector.shape_cast %159 : vector<8xf32> to vector<8x1xf32>
      %161 = arith.addf %155, %160 : vector<8x1xf32>
      %c1_i32_58 = arith.constant 1 : i32
      %162 = math.log %161 : vector<8x1xf32>
      %163 = arith.addf %152, %162 : vector<8x1xf32>
      %164 = vector.shape_cast %163 : vector<8x1xf32> to vector<1x8x1xf32>
      %cst_59 = arith.constant dense<0.000000e+00> : vector<1xf32>
      %165 = vector.multi_reduction <add>, %164, %cst_59 [1, 2] : vector<1x8x1xf32> to vector<1xf32>
      %166 = vector.shape_cast %165 : vector<1xf32> to vector<1x1x1xf32>
      %167 = vector.extract %166[0, 0, 0] : f32 from vector<1x1x1xf32>
      %168 = vector.broadcast %167 : f32 to vector<1x1xf32>
      %169 = arith.addf %168, %149 : vector<1x1xf32>
      %cst_60 = arith.constant 2.000000e+00 : f32
      %170 = vector.broadcast %cst_60 : f32 to vector<1x1xf32>
      %171 = arith.mulf %170, %134 : vector<1x1xf32>
      %172 = arith.subf %169, %171 : vector<1x1xf32>
      %c0_61 = arith.constant 0 : index
      %c0_62 = arith.constant 0 : index
      %173 = vector.load %arg8[%c0_61, %c0_62] : memref<8x128xf32, #tpu.memory_space<vmem>>, vector<8x128xf32>
      %c3_i32 = arith.constant 3 : i32
      %174 = vector.broadcast %c3_i32 : i32 to vector<1x128xi32>
      %175 = arith.cmpi eq, %0, %174 : vector<1x128xi32>
      %cst_63 = arith.constant 0.000000e+00 : f32
      %176 = vector.shape_cast %172 : vector<1x1xf32> to vector<1x1xf32>
      %177 = vector.broadcast %176 : vector<1x1xf32> to vector<1x128xf32>
      %178 = vector.broadcast %cst_63 : f32 to vector<1x128xf32>
      %179 = arith.select %175, %177, %178 : vector<1x128xi1>, vector<1x128xf32>
      %180 = vector.broadcast %179 : vector<1x128xf32> to vector<8x128xf32>
      %181 = arith.addf %173, %180 : vector<8x128xf32>
      %c0_64 = arith.constant 0 : index
      %c0_65 = arith.constant 0 : index
      %182 = vector.load %arg8[%c0_64, %c0_65] : memref<8x128xf32, #tpu.memory_space<vmem>>, vector<8x128xf32>
      tpu.vector_store %arg8[%c0_64, %c0_65], %181 {strides = array<i32>} : memref<8x128xf32, #tpu.memory_space<vmem>>, vector<8x128xf32>,
    } else {
    }
    return
  }
  func.func @transform_0(%arg0: i32, %arg1: i32) -> (i32, i32) {
    %c1_i32 = arith.constant 1 : i32
    %0 = arith.muli %arg0, %c1_i32 : i32
    %1 = arith.addi %0, %arg1 : i32
    %c0_i32 = arith.constant 0 : i32
    %c0_i32_0 = arith.constant 0 : i32
    return %1, %c0_i32 : i32, i32
  }
  func.func @transform_1(%arg0: i32, %arg1: i32) -> (i32, i32) {
    %c1_i32 = arith.constant 1 : i32
    %0 = arith.muli %arg0, %c1_i32 : i32
    %1 = arith.addi %0, %arg1 : i32
    %c0_i32 = arith.constant 0 : i32
    %c0_i32_0 = arith.constant 0 : i32
    return %1, %c0_i32 : i32, i32
  }
  func.func @transform_2(%arg0: i32, %arg1: i32) -> (i32, i32) {
    %c1_i32 = arith.constant 1 : i32
    %0 = arith.muli %arg0, %c1_i32 : i32
    %1 = arith.addi %0, %arg1 : i32
    %c0_i32 = arith.constant 0 : i32
    %c0_i32_0 = arith.constant 0 : i32
    return %1, %c0_i32 : i32, i32
  }
  func.func @transform_3(%arg0: i32, %arg1: i32) -> (i32, i32) {
    %c1_i32 = arith.constant 1 : i32
    %0 = arith.muli %arg0, %c1_i32 : i32
    %1 = arith.addi %0, %arg1 : i32
    %c0_i32 = arith.constant 0 : i32
    %c0_i32_0 = arith.constant 0 : i32
    return %1, %c0_i32 : i32, i32
  }
  func.func @transform_6(%arg0: i32, %arg1: i32) -> (i32, i32) {
    %c0_i32 = arith.constant 0 : i32
    %c0_i32_0 = arith.constant 0 : i32
    return %arg0, %c0_i32 : i32, i32
  }
}

</mosaic_0001>

<bundles_post_ra>
// kernel: tpu_custom_call.1
= control target key start
LH: loop header
LB: loop body
LE: loop exit
PB: predicated region body
PF: predicated region fallthrough
CT: control target
= control target key end

     0   :  { %11 = vsyncpa [#allocation7], 0  ;;  %s708_s0 = inlined_call_operand.vmem [shape: f32[8,128], index: 0, kind: input, shape index: {}]   ;;  %s709_s1 = inlined_call_operand.hbm [shape: f32[8,128], index: 1, kind: input, shape index: {}]   ;;  %s710_s2 = inlined_call_operand.vmem [shape: f32[8,128], index: 2, kind: input, shape index: {}]   ;;  %s711_s3 = inlined_call_operand.vmem [shape: s32[8,1], index: 3, kind: input, shape index: {}]   ;;  %s712_s4 = inlined_call_operand.vmem [shape: f32[8,128], index: 4, kind: input, shape index: {}]   ;;  %s713_s5 = inlined_call_operand.hbm [shape: f32[8,128], index: 5, kind: input, shape index: {}]   ;;  %s714_s6 = inlined_call_operand.hbm [shape: f32[8,128], index: 6, kind: output, shape index: {}]  }
   0x1   :  { %12 = vsyncpa [#allocation8], 0  ;;  %s598_s21 = smov [#allocation6]   ;;  %s524_s25 = scalar_lea.hbm %s709_s1, 128 }
   0x2   :  { %s30_s22 = sshll.u32 %s598_s21, 4  ;;  %p525_p0 = scmp.ne.s32.totalorder %s709_s1, %s524_s25  ;;  %s31_s22 = int_to_ptr.vmem [resolvable:$true] %s30_s22 }
   0x3   :  { %p528_p1 = scmp.lt.u32.totalorder %s524_s25, %s709_s1 }
   0x5   :  { %p530_p2 = pnand %p528_p1, %p525_p0 }
   0x7   :  { %533 = shalt.err (!%p530_p2)
}
   0x8   :  { %s534_s30 = scalar_lea.vmem %s31_s22, 128  ;;  %p539_p4 = scmp.lt.s32.totalorder %s31_s22, %s31_s22 }
   0x9   :  { %p535_p3 = scmp.ne.s32.totalorder %s31_s22, %s534_s30  ;;  %p540_p5 = scmp.lt.s32.totalorder %s534_s30, %s534_s30 }
   0xb   :  { %p541_p6 = por %p540_p5, %p539_p4 }
   0xd   :  { %p542_p7 = pnand %p541_p6, %p535_p3 }
   0xf   :  { %545 = shalt.err (!%p542_p7)
}
  0x10   :  { %33 = dma.hbm_to_vmem [thread:$0]  %s709_s1, 128, %s31_s22, [#allocation7]  }
  0x11   :  { %590 = dma.done.wait [#allocation7], 128  }
  0x12   :  { %591 = vsyncadd [#allocation7], 4294967168  ;;  %v87_v0 = vlaneseq  ;;  %v657_v2 = vld [vmem:[%s712_s4] sm:$0xff] }
  0x13   :  { %v158_v3 = vld [vmem:[%s708_s0] sm:$0xff] }
  0x14   :  { %v652_v1 = vand.u32 127, %v87_v0  ;;  %v209_v4 = vld [vmem:[%s710_s2] sm:$0xff]  ;;  %159 = vmax.xlane.f32.xlu0 %v158_v3 }
  0x15   :  { %210 = vmax.xlane.f32.xlu1 %v209_v4 }
  0x16   :  { %140 = vsyncadd [#allocation5], 128  ;;  %v184_v5 = vld [vmem:[#allocation6] sm:$0xff]  ;;  %v599_v6 = vmov 0   ;;  %v153_v7 = vld [vmem:[%s711_s3] sm:$0xff]  ;;  %vm173_vm1 = vcmask 7168  }
  0x17   :  { %500 = vset.pattern.permute.xlu1 %v599_v6  ;;  %501 = vset.pattern.permute.xlu0 %v599_v6  ;;  %s600_s0 = smov [#allocation4]   ;;  %s546_s16 = scalar_lea.hbm %s713_s5, 128 }
  0x18   :  { %185 = vmax.xlane.f32.xlu0 %v184_v5  ;;  %s149_s2 = sshll.u32 %s600_s0, 4  ;;  %p547_p8 = scmp.ne.s32.totalorder %s713_s5, %s546_s16  ;;  %s150_s2 = int_to_ptr.vmem [resolvable:$true] %s149_s2 }
  0x19   :  { %p550_p9 = scmp.lt.u32.totalorder %s546_s16, %s713_s5 }
  0x1b   :  { %p552_p10 = pnand %p550_p9, %p547_p8 }
  0x26   :  { %155 = vperm.xlu1 %500, %v153_v7  }
  0xa1   :  { %v160_v8 = vpop.xlane.xlu0 %159 }
  0xa2   :  { %v211_v9 = vpop.xlane.xlu1 %210  ;;  %v161_v10 = vsub.f32 %v158_v3, %v160_v8 }
  0xa3   :  { %v212_v12 = vsub.f32 %v209_v4, %v211_v9 }
  0xa4   :  { %v162_v11 = vmul.f32 1.442695, %v161_v10 }
  0xa5   :  { %v186_v13 = vpop.xlane.xlu0 %185  ;;  %v213_v18 = vmul.f32 1.442695, %v212_v12 }
  0xa6   :  { %v156_v14 = vpop.permute.xlu1 %155  ;;  %502 = vpow2.f32 %v162_v11  ;;  %v187_v15 = vsub.f32 %v184_v5, %v186_v13 }
  0xa7   :  { %vm157_vm0 = vcmp.eq.s32.totalorder %v652_v1, %v156_v14 }
  0xa8   :  { %v195_v16 = vsel %vm157_vm0, %v184_v5, 0.0  ;;  %v188_v17 = vmul.f32 1.442695, %v187_v15  ;;  %v169_v22 = vsel %vm157_vm0, %v158_v3, 0.0  ;;  %v220_v23 = vsel %vm157_vm0, %v209_v4, 0.0 }
  0xa9   :  { %196 = vadd.xlane.f32.xlu1 %v195_v16 }
  0xaa   :  { %504 = vpow2.f32 %v188_v17 }
  0xab   :  { %506 = vpow2.f32 %v213_v18 }
  0xb0   :  { %v503_v19 = vpop.eup %502 }
  0xb1   :  { %164 = vadd.xlane.f32.xlu0 %v503_v19 }
  0xb4   :  { %v505_v20 = vpop.eup %504 }
  0xb5   :  { %190 = vadd.xlane.f32.xlu0 %v505_v20  ;;  %v507_v21 = vpop.eup %506 }
  0xb9   :  { %215 = vadd.xlane.f32.xlu0 %v507_v21 }
  0xbd   :  { %170 = vadd.xlane.f32.xlu0 %v169_v22 }
  0xc1   :  { %221 = vadd.xlane.f32.xlu0 %v220_v23 }
 0x136   :  { %v197_v37 = vpop.xlane.xlu1 %196 }
 0x13e   :  { %v165_v24 = vpop.xlane.xlu0 %164 }
 0x13f   :  { %508 = vlog2.f32 %v165_v24 }
 0x142   :  { %v191_v25 = vpop.xlane.xlu0 %190 }
 0x143   :  { %510 = vlog2.f32 %v191_v25 }
 0x146   :  { %v216_v26 = vpop.xlane.xlu0 %215 }
 0x147   :  { %512 = vlog2.f32 %v216_v26 }
 0x149   :  { %v509_v27 = vpop.eup %508 }
 0x14a   :  { %v167_v28 = vmul.f32 0.6931472, %v509_v27  ;;  %v171_v31 = vpop.xlane.xlu0 %170 }
 0x14c   :  { %v168_v29 = vadd.f32 %v167_v28, %v160_v8 }
 0x14d   :  { %v511_v30 = vpop.eup %510 }
 0x14e   :  { %v193_v32 = vmul.f32 0.6931472, %v511_v30  ;;  %v172_v33 = vsub.f32 %v168_v29, %v171_v31  ;;  %v222_v42 = vpop.xlane.xlu0 %221 }
 0x150   :  { %v194_v34 = vadd.f32 %v193_v32, %v186_v13  ;;  %v174_v35 = vsel %vm173_vm1, %v172_v33, 0.0 }
 0x151   :  { %v513_v36 = vpop.eup %512  ;;  %175 = vadd.xlane.f32.xlu0 %v174_v35 }
 0x152   :  { %v218_v38 = vmul.f32 0.6931472, %v513_v36  ;;  %v198_v39 = vsub.f32 %v194_v34, %v197_v37 }
 0x154   :  { %v219_v40 = vadd.f32 %v218_v38, %v211_v9  ;;  %v199_v41 = vsel %vm173_vm1, %v198_v39, 0.0 }
 0x155   :  { %200 = vadd.xlane.f32.xlu0 %v199_v41 }
 0x156   :  { %v223_v43 = vsub.f32 %v219_v40, %v222_v42 }
 0x158   :  { %v224_v44 = vsel %vm173_vm1, %v223_v43, 0.0 }
 0x159   :  { %225 = vadd.xlane.f32.xlu0 %v224_v44 }
 0x15a   :  { %555 = shalt.err (!%p552_p10)  }
 0x15b   :  { %s556_s21 = scalar_lea.vmem %s150_s2, 128  ;;  %p561_p12 = scmp.lt.s32.totalorder %s150_s2, %s150_s2 }
 0x15c   :  { %p557_p11 = scmp.ne.s32.totalorder %s150_s2, %s556_s21  ;;  %p562_p13 = scmp.lt.s32.totalorder %s556_s21, %s556_s21 }
 0x15e   :  { %p563_p0 = por %p562_p13, %p561_p12 }
 0x160   :  { %p564_p1 = pnand %p563_p0, %p557_p11 }
 0x162   :  { %567 = shalt.err (!%p564_p1)  }
 0x163   :  { %152 = dma.hbm_to_vmem [thread:$0]  %s713_s5, 128, %s150_s2, [#allocation5 + $0x1]  ;;  %vm238_vm2 = vcmp.eq.s32.totalorder %v652_v1, 1  ;;  %vm235_vm3 = vcmp.eq.s32.totalorder %v652_v1, 0  ;;  %vm242_vm4 = vcmp.eq.s32.totalorder %v652_v1, 2 }
 0x1de   :  { %v176_v45 = vpop.xlane.xlu0 %175 }
 0x1df   :  { %v177_v46 = vrot.slane %v176_v45, 4 }
 0x1e1   :  { %v178_v47 = vadd.f32 %v177_v46, %v176_v45 }
 0x1e2   :  { %v201_v48 = vpop.xlane.xlu0 %200 }
 0x1e3   :  { %v179_v49 = vrot.slane %v178_v47, 2  ;;  %v202_v50 = vrot.slane %v201_v48, 4 }
 0x1e5   :  { %v203_v51 = vadd.f32 %v202_v50, %v201_v48  ;;  %v180_v52 = vadd.f32 %v179_v49, %v178_v47 }
 0x1e6   :  { %v226_v53 = vpop.xlane.xlu0 %225 }
 0x1e7   :  { %v204_v54 = vrot.slane %v203_v51, 2  ;;  %v227_v55 = vrot.slane %v226_v53, 4  ;;  %v181_v56 = vrot.slane %v180_v52, 1 }
 0x1e9   :  { %v228_v57 = vadd.f32 %v227_v55, %v226_v53  ;;  %v182_v58 = vadd.f32 %v181_v56, %v180_v52  ;;  %v205_v59 = vadd.f32 %v204_v54, %v203_v51 }
 0x1eb   :  { %v229_v60 = vrot.slane %v228_v57, 2  ;;  %482 = vpush %v182_v58  ;;  %v206_v61 = vrot.slane %v205_v59, 1 }
 0x1ed   :  { %v230_v62 = vadd.f32 %v229_v60, %v228_v57  ;;  %v207_v63 = vadd.f32 %v206_v61, %v205_v59 }
 0x1ef   :  { %484 = vpush %v207_v63  ;;  %v231_v3 = vrot.slane %v230_v62, 1 }
 0x1f1   :  { %v232_v4 = vadd.f32 %v231_v3, %v230_v62 }
 0x1f3   :  { %486 = vpush %v232_v4 }
 0x21c   :  { %s483_s5 = spop %482 }
 0x21d   :  { %v236_v5 = vstv %s483_s5 }
 0x21e   :  { %v237_v8 = vsel %vm235_vm3, %v236_v5, 0.0 }
 0x220   :  { %s485_s24 = spop %484 }
 0x221   :  { %v239_v6 = vstv %s485_s24 }
 0x222   :  { %v240_v7 = vsel %vm238_vm2, %v239_v6, 0.0 }
 0x223   :  { %v241_v9 = vadd.f32 %v240_v7, %v237_v8 }
 0x224   :  { %s487_s25 = spop %486 }
 0x225   :  { %v243_v10 = vstv %s487_s25 }
 0x226   :  { %v244_v11 = vsel %vm242_vm4, %v243_v10, 0.0 }
 0x227   :  { %v245_v12 = vadd.f32 %v244_v11, %v241_v9 }
 0x229   :  { %252 = vst [vmem:[#allocation9] sm:$0xff] %v245_v12 }
 0x22a   :  { %592 = dma.done.wait [#allocation5], 128 }
 0x22b   :  { %593 = vsyncadd [#allocation5], 4294967168 }
 0x22c   :  { %594 = dma.done.wait [#allocation5 + $0x1], 128 }
 0x22d   :  { %595 = vsyncadd [#allocation5 + $0x1], 4294967168  ;;  %v601_v13 = vmov 0.0   ;;  %vm602_vm5 = vmmov 0   ;;  %v264_v14 = vld [vmem:[#allocation4] sm:$0xff]  ;;  %v263_v15 = vshrl.u32 %v87_v0, 7 }
 0x22e   :  { %477 = vmatprep.subr.mxu0 %v601_v13  ;;  %479 = vmatprep.mubr.msk.f32.mxu0 %vm602_vm5, %v601_v13  ;;  %vm338_vm6 = vcmask 64512   ;;  %vm371_vm8 = vcmask 57344   ;;  %vm415_vm9 = vcmp.eq.s32.totalorder %v652_v1, 3  ;;  %s603_s29 = smov [#allocation9]  }
 0x22f   :  { %478 = vmatpush3.xpose.msra.mxu0 %v264_v14  ;;  %vm336_vm7 = vcmp.eq.s32.totalorder %v263_v15, %v652_v1  ;;  %s425_s30 = sshll.u32 %s603_s29, 4  ;;  %s426_s30 = int_to_ptr.vmem [resolvable:$true] %s425_s30 }
 0x230   :  { %s568_s7 = scalar_lea.vmem %s426_s30, 128  ;;  %p573_p3 = scmp.lt.s32.totalorder %s426_s30, %s426_s30 }
 0x231   :  { %p569_p2 = scmp.ne.s32.totalorder %s426_s30, %s568_s7  ;;  %p574_p4 = scmp.lt.s32.totalorder %s568_s7, %s568_s7 }
 0x232   :  { %480 = vmatmul.mubr.f32.vlgmr.msra.gmra.mrb[0].mxu0 %v657_v2 }
 0x233   :  { %p575_p5 = por %p574_p4, %p573_p3 }
 0x235   :  { %p576_p6 = pnand %p575_p5, %p569_p2 }
 0x305   :  { %v331_v16 = vpop.f32.mrb[0].mxu0 }
 0x306   :  { %v335_v17 = vmul.f32 14.285714, %v331_v16  ;;  %v481_v18 = vpop.f32.mrb[1].mxu0 }
 0x308   :  { %v351_v19 = vsel %vm338_vm6, %v335_v17, -inf  ;;  %v337_v20 = vsel %vm336_vm7, %v335_v17, 0.0 }
 0x309   :  { %384 = vmax.xlane.f32.xlu0 %v351_v19  ;;  %v352_v21 = vrot.slane %v351_v19, 4  ;;  %v339_v22 = vsel %vm338_vm6, %v337_v20, 0.0 }
 0x30a   :  { %340 = vadd.xlane.f32.xlu1 %v339_v22 }
 0x30b   :  { %v353_v23 = vmax.f32 %v351_v19, %v352_v21  ;;  %v414_v21 = vld [vmem:[#allocation9] sm:$0xff] }
 0x30d   :  { %v354_v24 = vrot.slane %v353_v23, 2 }
 0x30f   :  { %v355_v25 = vmax.f32 %v353_v23, %v354_v24 }
 0x311   :  { %v356_v2 = vrot.slane %v355_v25, 1 }
 0x313   :  { %v357_v26 = vmax.f32 %v355_v25, %v356_v2 }
 0x315   :  { %v358_v0 = vsub.f32 %v335_v17, %v357_v26 }
 0x317   :  { %v359_v27 = vmul.f32 1.442695, %v358_v0 }
 0x319   :  { %514 = vpow2.f32 %v359_v27 }
 0x323   :  { %v515_v28 = vpop.eup %514 }
 0x324   :  { %v361_v29 = vsel %vm338_vm6, %v515_v28, 0.0 }
 0x325   :  { %v362_v30 = vrot.slane %v361_v29, 4 }
 0x327   :  { %v363_v31 = vadd.f32 %v362_v30, %v361_v29 }
 0x329   :  { %v364_v32 = vrot.slane %v363_v31, 2 }
 0x32b   :  { %v365_v33 = vadd.f32 %v364_v32, %v363_v31 }
 0x32d   :  { %v366_v34 = vrot.slane %v365_v33, 1 }
 0x32f   :  { %v367_v35 = vadd.f32 %v366_v34, %v365_v33 }
 0x331   :  { %516 = vlog2.f32 %v367_v35 }
 0x33b   :  { %v517_v36 = vpop.eup %516 }
 0x33c   :  { %v369_v37 = vmul.f32 0.6931472, %v517_v36 }
 0x33e   :  { %v370_v38 = vadd.f32 %v369_v37, %v357_v26 }
 0x340   :  { %v372_v39 = vsel %vm371_vm8, %v370_v38, 0.0 }
 0x341   :  { %373 = vadd.xlane.f32.xlu1 %v372_v39 }
 0x396   :  { %v385_v40 = vpop.xlane.xlu0 %384 }
 0x397   :  { %v390_v41 = vsub.f32 %v335_v17, %v385_v40  ;;  %v341_v42 = vpop.xlane.xlu1 %340  ;;  %v386_v59 = vsub.f32 -inf, %v385_v40 }
 0x398   :  { %v342_v43 = vrot.slane %v341_v42, 4 }
 0x399   :  { %v391_v44 = vmul.f32 1.442695, %v390_v41  ;;  %v387_v60 = vmul.f32 1.442695, %v386_v59 }
 0x39a   :  { %v343_v45 = vadd.f32 %v342_v43, %v341_v42 }
 0x39b   :  { %518 = vpow2.f32 %v391_v44 }
 0x39c   :  { %v344_v46 = vrot.slane %v343_v45, 2  ;;  %520 = vpow2.f32 %v387_v60 }
 0x39e   :  { %v345_v47 = vadd.f32 %v344_v46, %v343_v45 }
 0x3a0   :  { %v346_v48 = vrot.slane %v345_v47, 1 }
 0x3a2   :  { %v347_v49 = vadd.f32 %v346_v48, %v345_v47 }
 0x3a4   :  { %488 = vpush %v347_v49 }
 0x3a5   :  { %v519_v50 = vpop.eup %518 }
 0x3a6   :  { %v393_v51 = vsel %vm338_vm6, %v519_v50, 0.0  ;;  %v521_v61 = vpop.eup %520 }
 0x3a7   :  { %394 = vadd.xlane.f32.xlu0 %v393_v51  ;;  %v389_v62 = vmul.f32 0.0, %v521_v61 }
 0x3ce   :  { %v374_v52 = vpop.xlane.xlu1 %373 }
 0x3cf   :  { %v375_v53 = vrot.slane %v374_v52, 4 }
 0x3d1   :  { %v376_v54 = vadd.f32 %v375_v53, %v374_v52 }
 0x3d3   :  { %v377_v55 = vrot.slane %v376_v54, 2 }
 0x3d5   :  { %v378_v56 = vadd.f32 %v377_v55, %v376_v54  ;;  %s489_s26 = spop %488 }
 0x3d6   :  { %v349_v15 = vstv %s489_s26 }
 0x3d7   :  { %v379_v57 = vrot.slane %v378_v56, 1  ;;  %v412_v18 = vmul.f32 2.0, %v349_v15 }
 0x3d9   :  { %v380_v58 = vadd.f32 %v379_v57, %v378_v56 }
 0x3db   :  { %490 = vpush %v380_v58 }
 0x40c   :  { %s491_s27 = spop %490 }
 0x40d   :  { %v382_v16 = vstv %s491_s27 }
 0x434   :  { %v395_v63 = vpop.xlane.xlu0 %394 }
 0x435   :  { %v396_v3 = vadd.f32 %v395_v63, %v389_v62 }
 0x437   :  { %522 = vlog2.f32 %v396_v3 }
 0x441   :  { %v523_v4 = vpop.eup %522 }
 0x442   :  { %v398_v5 = vmul.f32 0.6931472, %v523_v4 }
 0x444   :  { %v399_v6 = vadd.f32 %v398_v5, %v385_v40 }
 0x446   :  { %v400_v7 = vsel %vm173_vm1, %v399_v6, 0.0 }
 0x447   :  { %401 = vadd.xlane.f32.xlu0 %v400_v7 }
 0x4d4   :  { %v402_v8 = vpop.xlane.xlu0 %401 }
 0x4d5   :  { %v403_v9 = vrot.slane %v402_v8, 4 }
 0x4d7   :  { %v404_v10 = vadd.f32 %v403_v9, %v402_v8 }
 0x4d9   :  { %v405_v11 = vrot.slane %v404_v10, 2 }
 0x4db   :  { %v406_v12 = vadd.f32 %v405_v11, %v404_v10 }
 0x4dd   :  { %v407_v13 = vrot.slane %v406_v12, 1 }
 0x4df   :  { %v408_v14 = vadd.f32 %v407_v13, %v406_v12 }
 0x4e1   :  { %492 = vpush %v408_v14 }
 0x512   :  { %s493_s28 = spop %492 }
 0x513   :  { %v410_v17 = vstv %s493_s28 }
 0x514   :  { %v411_v19 = vadd.f32 %v410_v17, %v382_v16 }
 0x516   :  { %v413_v20 = vsub.f32 %v411_v19, %v412_v18 }
 0x518   :  { %v416_v22 = vsel %vm415_vm9, %v413_v20, 0.0 }
 0x519   :  { %v417_v23 = vadd.f32 %v416_v22, %v414_v21 }
 0x51b   :  { %418 = vst [vmem:[#allocation9] sm:$0xff] %v417_v23 }
 0x51c   :  { %579 = shalt.err (!%p576_p6)
}
 0x51d   :  { %s580_s10 = scalar_lea.hbm %s714_s6, 128 }
 0x51e   :  { %p581_p7 = scmp.ne.s32.totalorder %s714_s6, %s580_s10  ;;  %p584_p8 = scmp.lt.u32.totalorder %s580_s10, %s714_s6 }
 0x520   :  { %p586_p9 = pnand %p584_p8, %p581_p7 }
 0x522   :  { %589 = shalt.err (!%p586_p9)
}
 0x523   :  { %428 = dma.vmem_to_hbm [thread:$0]  %s426_s30, 128, %s714_s6, [#allocation8]  }
 0x524   :  { %596 = dma.done.wait [#allocation8], 128  }
 0x525   :  { %597 = vsyncadd [#allocation8], 4294967168 }
 0x526   :  { %432 = vsyncpa [#allocation7], 1 }
 0x527   :  { %433 = vsyncpa [#allocation8], 1 }
 0x528   :  { %434 = vsyncmov [#allocation5] }
 0x52b   :  { %s435_s0 = vpop.sfrf %434 }
 0x52c   :  { %p473_p10 = scmp.ne.s32.totalorder %s435_s0, 0 }
 0x52e   :  { %439 = shalt.err (%p473_p10)  }
 0x52f   :  { %441 = vsyncmov [#allocation5 + $0x1] }
 0x532   :  { %s442_s2 = vpop.sfrf %441 }
 0x533   :  { %p474_p11 = scmp.ne.s32.totalorder %s442_s2, 0 }
 0x535   :  { %446 = shalt.err (%p474_p11)  }

</bundles_post_ra>
